<compile_context>
chip_gen: v7x
topology: tpu7x:2x2x1
jax: 0.10.0
libtpu: 0.0.40
codegen_flags: <defaults>
</compile_context>

<pallas_src>
import jax
import jax.numpy as jnp
from jax import lax
from jax.experimental import pallas as pl
from jax.experimental.pallas import tpu as pltpu


def _round_up(n: int, m: int) -> int:
    return ((n + m - 1) // m) * m


def _vmem_capacity_bytes() -> int:
    """Physical VMEM per TensorCore; conservative fallback if unqueryable."""
    try:
        info = pltpu.get_tpu_info()
        cap = getattr(info, "vmem_capacity_bytes", None)
        if cap:
            return int(cap)
    except Exception:
        pass
    return 64 << 20  # conservative: v7x per-TC physical VMEM


def _num_tensorcores() -> int:
    # TODO(synk): replace the device-kind sniff with a proper core-count query.
    try:
        kind = (jax.devices()[0].device_kind or "").lower()
        if "v7" in kind:
            return 2
    except Exception:
        pass
    return 1


def _choose_tiling(N: int, D: int):
    """Pick a batch tile tm and an explicit scoped-VMEM limit."""
    vmem_cap = _vmem_capacity_bytes()
    # Leave ample headroom below physical; never exceed 96 MiB.
    vmem_limit = int(min((vmem_cap * 3) // 4, 96 << 20))
    budget = vmem_limit - (4 << 20)  # reserve for weights / sems / compiler scratch

    # Per-batch-row VMEM bytes (f32), with the D-wide last dim lane-padded to 128:
    #   2 inputs x 2 pipeline buffers x lanes x 4B   (x_s / x_t blocks)
    #   + lanes x 4B                                 (x = x_s * x_t temporary)
    #   + ~256B                                      (h_T column + output + slack)
    lanes = _round_up(max(D, 1), 128)
    per_row = 2 * 2 * lanes * 4 + lanes * 4 + 256

    tm_cap = (budget // per_row) // 512 * 512
    tm_cap = int(min(32768, max(512, tm_cap)))

    tm = min(_round_up(N, 128), tm_cap)

    # v7x only: when one block would cover the whole batch, split into two big
    # blocks so both TensorCores get work (never shrink below ~1024 rows).
    if _num_tensorcores() >= 2 and N > 2048 and pl.cdiv(N, tm) < 2:
        tm = max(1024, _round_up(pl.cdiv(N, 2), 128))

    return tm, vmem_limit


def _link_predictor_kernel(xs_ref, xt_ref, w1t_ref, b1_ref, w2_ref, b2_ref, o_ref):
    # Elementwise product, f32 on the VPU.  (tm, D)
    x = xs_ref[...] * xt_ref[...]

    # Hidden layer computed transposed so the batch sits on the 128-lane axis:
    #   h_T[H, tm] = W1^T(H, D) . x(tm, D)^T   (NT contraction on the MXU).
    h = lax.dot_general(
        w1t_ref[...], x,
        dimension_numbers=(((1,), (1,)), ((), ())),
        preferred_element_type=jnp.float32,
    )
    h = jnp.maximum(h + b1_ref[...], 0.0)            # + (H, 1) broadcast, ReLU

    # Output layer: z[1, tm] = sum_H w2[H] * h_T[H, :]  (sublane reduction, XLU)
    z = jnp.sum(h * w2_ref[...], axis=0, keepdims=True) + b2_ref[...]

    # Lane-dense, unmasked store of the (1, 1, tm) row.
    o_ref[...] = jax.nn.sigmoid(z).reshape(o_ref.shape)


def link_predictor(x_s, x_t, w1, b1, w2, b2):
    """Fused LinkPredictor forward.  x_s, x_t: [N, D]; returns [N, 1] float32."""
    N, D = x_s.shape
    H = w1.shape[1]

    tm, vmem_limit = _choose_tiling(N, D)
    g = pl.cdiv(N, tm)

    # Tiny resident parameters (constant index_maps -> stay in VMEM).
    w1_t = jnp.asarray(w1.T, dtype=jnp.float32)        # (H, D)
    b1_col = b1.reshape(H, 1).astype(jnp.float32)      # (H, 1)
    w2_col = w2.reshape(H, 1).astype(jnp.float32)      # (H, 1)
    b2_sc = b2.reshape(1, 1).astype(jnp.float32)       # (1, 1)

    cost = pl.CostEstimate(
        flops=int(2 * N * D * H + 2 * N * H + N * D),
        transcendentals=int(N),
        bytes_accessed=int(2 * N * D * 4 + N * 4 + (D * H + 2 * H + 1) * 4),
    )

    out = pl.pallas_call(
        _link_predictor_kernel,
        out_shape=jax.ShapeDtypeStruct((g, 1, tm), jnp.float32),
        grid_spec=pltpu.PrefetchScalarGridSpec(
            num_scalar_prefetch=0,
            grid=(g,),
            in_specs=[
                pl.BlockSpec((tm, D), lambda i: (i, 0)),   # x_s tile (f32)
                pl.BlockSpec((tm, D), lambda i: (i, 0)),   # x_t tile (f32)
                pl.BlockSpec((H, D), lambda i: (0, 0)),    # W1^T (resident)
                pl.BlockSpec((H, 1), lambda i: (0, 0)),    # b1   (resident)
                pl.BlockSpec((H, 1), lambda i: (0, 0)),    # W2   (resident)
                pl.BlockSpec((1, 1), lambda i: (0, 0)),    # b2   (resident)
            ],
            # Lane-dense output slab: one (1, 1, tm) row per grid step.
            out_specs=pl.BlockSpec((1, 1, tm), lambda i: (i, 0, 0)),
        ),
        compiler_params=pltpu.CompilerParams(
            dimension_semantics=("parallel",),
            vmem_limit_bytes=vmem_limit,
        ),
        cost_estimate=cost,
    )(x_s.astype(jnp.float32), x_t.astype(jnp.float32), w1_t, b1_col, w2_col, b2_sc)

    # Tail rows of the last (partial) block are garbage by design; drop them.
    return out.reshape(g * tm, 1)[:N]


def _reference(x_s, x_t, w1, b1, w2, b2):
    x = x_s * x_t
    h = jnp.maximum(x @ w1 + b1.reshape(1, -1), 0.0)
    z = h @ w2.reshape(-1, 1) + b2.reshape(1, 1)
    return jax.nn.sigmoid(z)


if __name__ == "__main__":
    # Shapes: batch N=128, input_dim D=32, hidden_dim H=32, output dim 1.
    N, D, H = 128, 32, 32

    key = jax.random.PRNGKey(0)
    k_xs, k_xt, k_w1, k_b1, k_w2, k_b2, k_xs2, k_xt2 = jax.random.split(key, 8)

    x_s = jax.random.normal(k_xs, (N, D), dtype=jnp.float32)
    x_t = jax.random.normal(k_xt, (N, D), dtype=jnp.float32)

    # Deterministic synthetic parameters (not a checkpoint).
    w1 = jax.random.normal(k_w1, (D, H), dtype=jnp.float32) * (1.0 / jnp.sqrt(D))
    b1 = jax.random.normal(k_b1, (H,), dtype=jnp.float32) * 0.01
    w2 = jax.random.normal(k_w2, (H, 1), dtype=jnp.float32) * (1.0 / jnp.sqrt(H))
    b2 = jax.random.normal(k_b2, (1,), dtype=jnp.float32) * 0.01

    # Case 1: small aligned batch -> single block, grid=(1,).
    out = jax.block_until_ready(link_predictor(x_s, x_t, w1, b1, w2, b2))
    ref = _reference(x_s, x_t, w1, b1, w2, b2)
    assert out.shape == (N, 1)
    assert jnp.allclose(out, ref, atol=2e-2, rtol=2e-2), "mismatch vs reference (N=128)"

    # Case 2: non-128-multiple batch -> exercises the partial-last-block path
    # (no input padding; garbage tail rows are computed and sliced off).
    N2 = 200
    x_s2 = jax.random.normal(k_xs2, (N2, D), dtype=jnp.float32)
    x_t2 = jax.random.normal(k_xt2, (N2, D), dtype=jnp.float32)
    out2 = jax.block_until_ready(link_predictor(x_s2, x_t2, w1, b1, w2, b2))
    ref2 = _reference(x_s2, x_t2, w1, b1, w2, b2)
    assert out2.shape == (N2, 1)
    assert jnp.allclose(out2, ref2, atol=2e-2, rtol=2e-2), "mismatch vs reference (N=200)"

    print("KERNEL_OK")
</pallas_src>

<mosaic_0001>
module attributes {stable_mosaic.version = 11 : i64} {
  func.func @_link_predictor_kernel(%arg0: i32, %arg1: memref<128x32xf32, #tpu.memory_space<vmem>>, %arg2: memref<128x32xf32, #tpu.memory_space<vmem>>, %arg3: memref<32x32xf32, #tpu.memory_space<vmem>>, %arg4: memref<32x1xf32, #tpu.memory_space<vmem>>, %arg5: memref<32x1xf32, #tpu.memory_space<vmem>>, %arg6: memref<1x1xf32, #tpu.memory_space<vmem>>, %arg7: memref<1x1x128xf32, #tpu.memory_space<vmem>>) attributes {dimension_semantics = [#tpu.dimension_semantics<parallel>], iteration_bounds = array<i64: 1>, scalar_prefetch = 0 : i64, scratch_operands = 0 : i64, tpu.core_type = #tpu.core_type<tc>, window_params = [{transform_indices = @transform_0, window_bounds = array<i64: 128, 32>}, {transform_indices = @transform_1, window_bounds = array<i64: 128, 32>}, {pipeline_mode = #tpu.pipeline_mode<synchronous>, transform_indices = @transform_2, window_bounds = array<i64: 32, 32>}, {pipeline_mode = #tpu.pipeline_mode<synchronous>, transform_indices = @transform_3, window_bounds = array<i64: 32, 1>}, {pipeline_mode = #tpu.pipeline_mode<synchronous>, transform_indices = @transform_4, window_bounds = array<i64: 32, 1>}, {pipeline_mode = #tpu.pipeline_mode<synchronous>, transform_indices = @transform_5, window_bounds = array<i64: 1, 1>}, {transform_indices = @transform_6, window_bounds = array<i64: 1, 1, 128>}]} {
    %c0 = arith.constant 0 : index
    %c0_0 = arith.constant 0 : index
    %0 = vector.load %arg1[%c0, %c0_0] : memref<128x32xf32, #tpu.memory_space<vmem>>, vector<128x32xf32>
    %c0_1 = arith.constant 0 : index
    %c0_2 = arith.constant 0 : index
    %1 = vector.load %arg2[%c0_1, %c0_2] : memref<128x32xf32, #tpu.memory_space<vmem>>, vector<128x32xf32>
    %2 = arith.mulf %0, %1 : vector<128x32xf32>
    %c0_3 = arith.constant 0 : index
    %c0_4 = arith.constant 0 : index
    %3 = vector.load %arg3[%c0_3, %c0_4] : memref<32x32xf32, #tpu.memory_space<vmem>>, vector<32x32xf32>
    %cst = arith.constant dense<0.000000e+00> : vector<32x128xf32>
    %4 = tpu.matmul %3, %2, %cst {dimension_numbers = #tpu.dot_dimension_numbers<[1], [1], [0], [0], [0, 0, 1, 0], [], []>} : vector<32x32xf32>, vector<128x32xf32>, vector<32x128xf32> -> vector<32x128xf32>
    %c0_5 = arith.constant 0 : index
    %c0_6 = arith.constant 0 : index
    %5 = vector.load %arg4[%c0_5, %c0_6] : memref<32x1xf32, #tpu.memory_space<vmem>>, vector<32x1xf32>
    %6 = vector.broadcast %5 : vector<32x1xf32> to vector<32x128xf32>
    %7 = arith.addf %4, %6 : vector<32x128xf32>
    %cst_7 = arith.constant 0.000000e+00 : f32
    %8 = vector.broadcast %cst_7 : f32 to vector<32x128xf32>
    %9 = arith.maximumf %7, %8 : vector<32x128xf32>
    %c0_8 = arith.constant 0 : index
    %c0_9 = arith.constant 0 : index
    %10 = vector.load %arg5[%c0_8, %c0_9] : memref<32x1xf32, #tpu.memory_space<vmem>>, vector<32x1xf32>
    %11 = vector.broadcast %10 : vector<32x1xf32> to vector<32x128xf32>
    %12 = arith.mulf %9, %11 : vector<32x128xf32>
    %cst_10 = arith.constant dense<0.000000e+00> : vector<128xf32>
    %13 = vector.multi_reduction <add>, %12, %cst_10 [0] : vector<32x128xf32> to vector<128xf32>
    %14 = vector.shape_cast %13 : vector<128xf32> to vector<1x128xf32>
    %c0_11 = arith.constant 0 : index
    %c0_12 = arith.constant 0 : index
    %15 = vector.load %arg6[%c0_11, %c0_12] : memref<1x1xf32, #tpu.memory_space<vmem>>, vector<1x1xf32>
    %16 = vector.broadcast %15 : vector<1x1xf32> to vector<1x128xf32>
    %17 = arith.addf %14, %16 : vector<1x128xf32>
    %18 = arith.negf %17 : vector<1x128xf32>
    %19 = math.exp %18 : vector<1x128xf32>
    %cst_13 = arith.constant 1.000000e+00 : f32
    %20 = vector.broadcast %cst_13 : f32 to vector<1x128xf32>
    %21 = arith.addf %20, %19 : vector<1x128xf32>
    %22 = arith.divf %20, %21 : vector<1x128xf32>
    %23 = vector.shape_cast %22 : vector<1x128xf32> to vector<1x1x128xf32>
    %c0_14 = arith.constant 0 : index
    %c0_15 = arith.constant 0 : index
    %c0_16 = arith.constant 0 : index
    %24 = vector.load %arg7[%c0_14, %c0_15, %c0_16] : memref<1x1x128xf32, #tpu.memory_space<vmem>>, vector<1x1x128xf32>
    tpu.vector_store %arg7[%c0_14, %c0_15, %c0_16], %23 {strides = array<i32>} : memref<1x1x128xf32, #tpu.memory_space<vmem>>, vector<1x1x128xf32>,
    return
  }
  func.func @transform_0(%arg0: i32) -> (i32, i32) {
    %c0_i32 = arith.constant 0 : i32
    %c0_i32_0 = arith.constant 0 : i32
    return %arg0, %c0_i32 : i32, i32
  }
  func.func @transform_1(%arg0: i32) -> (i32, i32) {
    %c0_i32 = arith.constant 0 : i32
    %c0_i32_0 = arith.constant 0 : i32
    return %arg0, %c0_i32 : i32, i32
  }
  func.func @transform_2(%arg0: i32) -> (i32, i32) {
    %c0_i32 = arith.constant 0 : i32
    %c0_i32_0 = arith.constant 0 : i32
    %c0_i32_1 = arith.constant 0 : i32
    return %c0_i32, %c0_i32_0 : i32, i32
  }
  func.func @transform_3(%arg0: i32) -> (i32, i32) {
    %c0_i32 = arith.constant 0 : i32
    %c0_i32_0 = arith.constant 0 : i32
    %c0_i32_1 = arith.constant 0 : i32
    return %c0_i32, %c0_i32_0 : i32, i32
  }
  func.func @transform_4(%arg0: i32) -> (i32, i32) {
    %c0_i32 = arith.constant 0 : i32
    %c0_i32_0 = arith.constant 0 : i32
    %c0_i32_1 = arith.constant 0 : i32
    return %c0_i32, %c0_i32_0 : i32, i32
  }
  func.func @transform_5(%arg0: i32) -> (i32, i32) {
    %c0_i32 = arith.constant 0 : i32
    %c0_i32_0 = arith.constant 0 : i32
    %c0_i32_1 = arith.constant 0 : i32
    return %c0_i32, %c0_i32_0 : i32, i32
  }
  func.func @transform_6(%arg0: i32) -> (i32, i32, i32) {
    %c0_i32 = arith.constant 0 : i32
    %c0_i32_0 = arith.constant 0 : i32
    %c0_i32_1 = arith.constant 0 : i32
    return %arg0, %c0_i32, %c0_i32_0 : i32, i32, i32
  }
}

</mosaic_0001>

<bundles_post_ra>
// kernel: tpu_custom_call.1
= control target key start
LH: loop header
LB: loop body
LE: loop exit
PB: predicated region body
PF: predicated region fallthrough
CT: control target
= control target key end

     0   :  { %s754_s0 = inlined_call_operand.vmem [shape: f32[128,32], index: 0, kind: input, shape index: {}]   ;;  %s755_s1 = inlined_call_operand.vmem [shape: f32[128,32], index: 1, kind: input, shape index: {}]   ;;  %s756_s2 = inlined_call_operand.vmem [shape: f32[32,32], index: 2, kind: input, shape index: {}]   ;;  %s757_s3 = inlined_call_operand.vmem [shape: f32[32,1], index: 3, kind: input, shape index: {}]   ;;  %s758_s4 = inlined_call_operand.vmem [shape: f32[32,1], index: 4, kind: input, shape index: {}]   ;;  %s759_s5 = inlined_call_operand.<no memory space> [shape: f32[1,1], index: 5, kind: input, shape index: {}]   ;;  %s760_s6 = inlined_call_operand.hbm [shape: f32[1,1,128], index: 6, kind: output, shape index: {}]  }
   0x1   :  { %v11_v0 = vstv %s759_s5 }
   0x2   :  { %12 = vst [vmem:[#allocation2] sm:$0x1] %v11_v0 }
   0x3   :  { %v26_v1 = vld [vmem:[%s754_s0] sm:$0xff]  ;;  %v27_v2 = vld [vmem:[%s754_s0 + $0x8] sm:$0xff]  ;;  %vm102_vm0 = vcmask 261120   ;;  %v28_v6 = vld [vmem:[%s754_s0 + $0x10] sm:$0xff]  ;;  %v496_v7 = vmov 0  }
   0x4   :  { %v42_v3 = vld [vmem:[%s755_s1] sm:$0xff]  ;;  %v43_v4 = vld [vmem:[%s755_s1 + $0x8] sm:$0xff]  ;;  %466 = vset.pattern.permute.xlu0 %v496_v7  ;;  %467 = vset.pattern.permute.xlu1 %v496_v7  ;;  %v29_v9 = vld [vmem:[%s754_s0 + $0x18] sm:$0xff] }
   0x5   :  { %v58_v5 = vmul.f32 %v42_v3, %v26_v1  ;;  %v59_v8 = vmul.f32 %v43_v4, %v27_v2  ;;  %v44_v10 = vld [vmem:[%s755_s1 + $0x10] sm:$0xff]  ;;  %v45_v11 = vld [vmem:[%s755_s1 + $0x18] sm:$0xff]  ;;  %vm562_vm1 = vmpackc.low %vm102_vm0, %vm102_vm0 }
   0x6   :  { %v60_v13 = vmul.f32 %v44_v10, %v28_v6  ;;  %v61_v14 = vmul.f32 %v45_v11, %v29_v9  ;;  %v30_v16 = vld [vmem:[%s754_s0 + $0x20] sm:$0xff]  ;;  %v31_v18 = vld [vmem:[%s754_s0 + $0x28] sm:$0xff]  ;;  %v76_v24 = vld [vmem:[%s756_s2 + $0x10] sm:$0xff] }
   0x7   :  { %v400_v15 = vpack.c.bf16 %v59_v8, %v58_v5  ;;  %v46_v19 = vld [vmem:[%s755_s1 + $0x20] sm:$0xff]  ;;  %v47_v20 = vld [vmem:[%s755_s1 + $0x28] sm:$0xff]  ;;  %v32_v26 = vld [vmem:[%s754_s0 + $0x30] sm:$0xff]  ;;  %397 = vmatprep.mubr.msk.f32.mxu1 %vm102_vm0, %v76_v24 }
   0x8   :  { %v406_v17 = vpack.c.bf16 %v61_v14, %v60_v13  ;;  %v62_v21 = vmul.f32 %v46_v19, %v30_v16  ;;  %v63_v22 = vmul.f32 %v47_v20, %v31_v18  ;;  %v74_v23 = vld [vmem:[%s756_s2] sm:$0xff]  ;;  %v33_v27 = vld [vmem:[%s754_s0 + $0x38] sm:$0xff]  ;;  %v48_v29 = vld [vmem:[%s755_s1 + $0x30] sm:$0xff] }
   0x9   :  { %402 = vmatprep.subr.msk.bf16.mxu0 %vm562_vm1, %v400_v15  ;;  %448 = vmatprep.subr.msk.bf16.mxu1 %vm562_vm1, %v400_v15  ;;  %v78_v28 = vld [vmem:[%s757_s3] sm:$0xff]  ;;  %v49_v30 = vld [vmem:[%s755_s1 + $0x38] sm:$0xff]  ;;  %v80_v31 = vld [vmem:[%s757_s3 + $0x10] sm:$0xff] }
   0xa   :  { %405 = vmatpush3.bf16.xpose.msk.msra.mxu0 %vm562_vm1, %v400_v15  ;;  %456 = vmatpush3.bf16.xpose.msk.msra.mxu1 %vm562_vm1, %v400_v15  ;;  %v412_v25 = vpack.c.bf16 %v63_v22, %v62_v21  ;;  %v79_v32 = vld [vmem:[%s757_s3 + $0x8] sm:$0xff]  ;;  %v81_v33 = vld [vmem:[%s757_s3 + $0x18] sm:$0xff] }
   0xb   :  { %408 = vmatprep.subr.msk.bf16.mxu0 %vm562_vm1, %v406_v17  ;;  %449 = vmatprep.subr.msk.bf16.mxu1 %vm562_vm1, %v406_v17 }
   0xc   :  { %394 = vmatprep.mubr.msk.f32.mxu0 %vm102_vm0, %v74_v23  ;;  %84 = vperm.xlu0 %466, %v78_v28  }
   0xd   :  { %94 = vperm.xlu1 %467, %v80_v31  }
  0x12   :  { %411 = vmatpush3.bf16.xpose.msk.msra.mxu0 %vm562_vm1, %v406_v17  ;;  %457 = vmatpush3.bf16.xpose.msk.msra.mxu1 %vm562_vm1, %v406_v17 }
  0x13   :  { %13 = vsyncpa [#allocation4], 0  ;;  %414 = vmatprep.subr.msk.bf16.mxu0 %vm562_vm1, %v412_v25  ;;  %450 = vmatprep.subr.msk.bf16.mxu1 %vm562_vm1, %v412_v25  ;;  %v64_v34 = vmul.f32 %v48_v29, %v32_v26  ;;  %v65_v35 = vmul.f32 %v49_v30, %v33_v27  ;;  %v252_v36 = vld [vmem:[%s758_s4] sm:$0xff]  ;;  %v253_v37 = vld [vmem:[%s758_s4 + $0x8] sm:$0xff] }
  0x14   :  { %89 = vperm.xlu0 %466, %v79_v32   ;;  %99 = vperm.xlu1 %467, %v81_v33   ;;  %v34_v39 = vld [vmem:[%s754_s0 + $0x40] sm:$0xff]  ;;  %v35_v40 = vld [vmem:[%s754_s0 + $0x48] sm:$0xff]  ;;  %v254_v43 = vld [vmem:[%s758_s4 + $0x10] sm:$0xff] }
  0x15   :  { %v418_v38 = vpack.c.bf16 %v65_v35, %v64_v34  ;;  %v50_v41 = vld [vmem:[%s755_s1 + $0x40] sm:$0xff]  ;;  %v51_v42 = vld [vmem:[%s755_s1 + $0x48] sm:$0xff]  ;;  %v255_v44 = vld [vmem:[%s758_s4 + $0x18] sm:$0xff]  ;;  %v295_v34 = vlaneseq }
  0x16   :  { %v66_v45 = vmul.f32 %v50_v41, %v34_v39  ;;  %v67_v46 = vmul.f32 %v51_v42, %v35_v40  ;;  %v289_v47 = vld [vmem:[#allocation2] sm:$0x1]  ;;  %v36_v49 = vld [vmem:[%s754_s0 + $0x50] sm:$0xff]  ;;  %v37_v50 = vld [vmem:[%s754_s0 + $0x58] sm:$0xff] }
  0x17   :  { %v52_v51 = vld [vmem:[%s755_s1 + $0x50] sm:$0xff]  ;;  %v53_v52 = vld [vmem:[%s755_s1 + $0x58] sm:$0xff]  ;;  %v38_v56 = vld [vmem:[%s754_s0 + $0x60] sm:$0xff] }
  0x18   :  { %258 = vperm.xlu0 %466, %v252_v36   ;;  %263 = vperm.xlu1 %467, %v253_v37   ;;  %v424_v48 = vpack.c.bf16 %v67_v46, %v66_v45  ;;  %v68_v53 = vmul.f32 %v52_v51, %v36_v49  ;;  %v69_v54 = vmul.f32 %v53_v52, %v37_v50  ;;  %v39_v57 = vld [vmem:[%s754_s0 + $0x68] sm:$0xff]  ;;  %v54_v58 = vld [vmem:[%s755_s1 + $0x60] sm:$0xff]  ;;  %v40_v63 = vld [vmem:[%s754_s0 + $0x70] sm:$0xff]  ;;  %v296_v37 = vshrl.u32 %v295_v34, 7 }
  0x19   :  { %v55_v59 = vld [vmem:[%s755_s1 + $0x68] sm:$0xff]  ;;  %v70_v60 = vmul.f32 %v54_v58, %v38_v56  ;;  %v41_v0 = vld [vmem:[%s754_s0 + $0x78] sm:$0xff]  ;;  %v56_v1 = vld [vmem:[%s755_s1 + $0x70] sm:$0xff] }
  0x1a   :  { %417 = vmatpush3.bf16.xpose.msk.msra.mxu0 %vm562_vm1, %v412_v25  ;;  %458 = vmatpush3.bf16.xpose.msk.msra.mxu1 %vm562_vm1, %v412_v25  ;;  %v430_v55 = vpack.c.bf16 %v69_v54, %v68_v53  ;;  %v71_v61 = vmul.f32 %v55_v59, %v39_v57  ;;  %v57_v2 = vld [vmem:[%s755_s1 + $0x78] sm:$0xff]  ;;  %v72_v3 = vmul.f32 %v56_v1, %v40_v63  ;;  %v75_v6 = vld [vmem:[%s756_s2 + $0x8] sm:$0xff]  ;;  %v297_v40 = vsub.s32 0, %v296_v37 }
  0x1b   :  { %420 = vmatprep.subr.msk.bf16.mxu0 %vm562_vm1, %v418_v38  ;;  %451 = vmatprep.subr.msk.bf16.mxu1 %vm562_vm1, %v418_v38  ;;  %v73_v4 = vmul.f32 %v57_v2, %v41_v0  ;;  %v77_v7 = vld [vmem:[%s756_s2 + $0x18] sm:$0xff]  ;;  %s497_s2 = smov [#allocation3]  }
  0x1c   :  { %268 = vperm.xlu0 %466, %v254_v43   ;;  %273 = vperm.xlu1 %467, %v255_v44   ;;  %v436_v62 = vpack.c.bf16 %v71_v61, %v70_v60  ;;  %s313_s5 = sshll.u32 %s497_s2, 4  ;;  %s314_s5 = int_to_ptr.vmem [resolvable:$true] %s313_s5 }
  0x1d   :  { %v442_v5 = vpack.c.bf16 %v73_v4, %v72_v3  ;;  %s472_s7 = scalar_lea.vmem %s314_s5, 16  ;;  %s476_s8 = scalar_lea.vmem %s314_s5, 32 }
  0x1e   :  { %p473_p0 = scmp.ne.s32.totalorder %s314_s5, %s472_s7  ;;  %p477_p1 = scmp.lt.s32.totalorder %s314_s5, %s314_s5 }
  0x1f   :  { %p478_p2 = scmp.lt.s32.totalorder %s476_s8, %s472_s7 }
  0x20   :  { %292 = vperm.xlu0 %466, %v289_v47  }
  0x21   :  { %p479_p3 = por %p478_p2, %p477_p1 }
  0x22   :  { %423 = vmatpush3.bf16.xpose.msk.msra.mxu0 %vm562_vm1, %v418_v38  ;;  %459 = vmatpush3.bf16.xpose.msk.msra.mxu1 %vm562_vm1, %v418_v38 }
  0x23   :  { %426 = vmatprep.subr.msk.bf16.mxu0 %vm562_vm1, %v424_v48  ;;  %452 = vmatprep.subr.msk.bf16.mxu1 %vm562_vm1, %v424_v48  ;;  %p480_p4 = pnand %p479_p3, %p473_p0 }
  0x2a   :  { %429 = vmatpush3.bf16.xpose.msk.msra.mxu0 %vm562_vm1, %v424_v48  ;;  %460 = vmatpush3.bf16.xpose.msk.msra.mxu1 %vm562_vm1, %v424_v48 }
  0x2b   :  { %432 = vmatprep.subr.msk.bf16.mxu0 %vm562_vm1, %v430_v55  ;;  %453 = vmatprep.subr.msk.bf16.mxu1 %vm562_vm1, %v430_v55 }
  0x32   :  { %435 = vmatpush3.bf16.xpose.msk.msra.mxu0 %vm562_vm1, %v430_v55  ;;  %461 = vmatpush3.bf16.xpose.msk.msra.mxu1 %vm562_vm1, %v430_v55 }
  0x33   :  { %438 = vmatprep.subr.msk.bf16.mxu0 %vm562_vm1, %v436_v62  ;;  %454 = vmatprep.subr.msk.bf16.mxu1 %vm562_vm1, %v436_v62 }
  0x3a   :  { %441 = vmatpush3.bf16.xpose.msk.msra.mxu0 %vm562_vm1, %v436_v62  ;;  %462 = vmatpush3.bf16.xpose.msk.msra.mxu1 %vm562_vm1, %v436_v62 }
  0x3b   :  { %444 = vmatprep.subr.msk.bf16.mxu0 %vm562_vm1, %v442_v5  ;;  %455 = vmatprep.subr.msk.bf16.mxu1 %vm562_vm1, %v442_v5 }
  0x42   :  { %447 = vmatpush3.bf16.xpose.msk.msra.mxu0 %vm562_vm1, %v442_v5  ;;  %463 = vmatpush3.bf16.xpose.msk.msra.mxu1 %vm562_vm1, %v442_v5 }
  0x49   :  { %395 = vmatmul.mubr.msk.f32.vlgmr.msra.gmra.mrb[0].mxu0 %vm102_vm0, %v75_v6  ;;  %398 = vmatmul.mubr.msk.f32.vlgmr.msra.gmra.mrb[0].mxu1 %vm102_vm0, %v77_v7 }
  0x8b   :  { %v85_v8 = vpop.permute.xlu0 %84 }
  0x8c   :  { %v95_v9 = vpop.permute.xlu1 %94 }
  0x93   :  { %v90_v10 = vpop.permute.xlu0 %89  ;;  %v100_v11 = vpop.permute.xlu1 %99 }
  0x97   :  { %v259_v13 = vpop.permute.xlu0 %258  ;;  %v264_v21 = vpop.permute.xlu1 %263 }
  0x9b   :  { %v269_v28 = vpop.permute.xlu0 %268  ;;  %v274_v31 = vpop.permute.xlu1 %273 }
  0x9f   :  { %v293_v42 = vpop.permute.xlu0 %292 }
  0xa0   :  { %v298_v44 = vrot.slane %v293_v42, %v297_v40 }
 0x11c   :  { %v396_v14 = vpop.f32.mrb[0].mxu0  ;;  %v399_v12 = vpop.f32.mrb[0].mxu1 }
 0x11d   :  { %v235_v15 = vadd.f32 %v396_v14, %v90_v10  ;;  %v229_v16 = vpop.f32.mrb[1].mxu0  ;;  %v239_v17 = vpop.f32.mrb[1].mxu1  ;;  %v245_v18 = vadd.f32 %v399_v12, %v100_v11 }
 0x11e   :  { %v230_v19 = vadd.f32 %v229_v16, %v85_v8  ;;  %v240_v20 = vadd.f32 %v239_v17, %v95_v9 }
 0x11f   :  { %v249_v22 = vmax.f32 %v235_v15, 0.0  ;;  %v251_v26 = vmax.f32 %v245_v18, 0.0 }
 0x120   :  { %v248_v23 = vmax.f32 %v230_v19, 0.0  ;;  %v250_v24 = vmax.f32 %v240_v20, 0.0 }
 0x121   :  { %v277_v25 = vmul.f32 %v264_v21, %v249_v22  ;;  %v279_v32 = vmul.f32 %v274_v31, %v251_v26 }
 0x122   :  { %v276_v27 = vmul.f32 %v259_v13, %v248_v23  ;;  %v278_v30 = vmul.f32 %v269_v28, %v250_v24 }
 0x124   :  { %v280_v29 = vadd.f32 %v277_v25, %v276_v27 }
 0x126   :  { %v281_v33 = vadd.f32 %v280_v29, %v278_v30 }
 0x128   :  { %v282_v35 = vadd.f32 %v281_v33, %v279_v32 }
 0x12a   :  { %v283_v36 = vrot.slane %v282_v35, 4 }
 0x12c   :  { %v284_v38 = vadd.f32 %v283_v36, %v282_v35 }
 0x12e   :  { %v285_v39 = vrot.slane %v284_v38, 2 }
 0x130   :  { %v286_v41 = vadd.f32 %v285_v39, %v284_v38 }
 0x132   :  { %v287_v43 = vrot.slane %v286_v41, 1 }
 0x134   :  { %v288_v45 = vadd.f32 %v287_v43, %v286_v41 }
 0x136   :  { %v299_v46 = vadd.f32 %v298_v44, %v288_v45 }
 0x138   :  { %v341_v47 = vmul.f32 -1.442695, %v299_v46 }
 0x13a   :  { %468 = vpow2.f32 %v341_v47 }
 0x144   :  { %v469_v48 = vpop.eup %468 }
 0x145   :  { %v303_v49 = vadd.f32 1.0, %v469_v48 }
 0x147   :  { %470 = vrcp.f32 %v303_v49 }
 0x151   :  { %v471_v50 = vpop.eup %470 }
 0x152   :  { %306 = vst [vmem:[#allocation3] sm:$0x1] %v471_v50 }
 0x153   :  { %483 = shalt.err (!%p480_p4)
}
 0x154   :  { %s484_s4 = scalar_lea.hbm %s760_s6, 16 }
 0x155   :  { %p485_p5 = scmp.ne.s32.totalorder %s760_s6, %s484_s4  ;;  %p488_p6 = scmp.lt.u32.totalorder %s484_s4, %s760_s6 }
 0x157   :  { %p490_p7 = pnand %p488_p6, %p485_p5 }
 0x159   :  { %493 = shalt.err (!%p490_p7)
}
 0x15a   :  { %316 = dma.vmem_to_hbm [thread:$0]  %s314_s5, 16, %s760_s6, [#allocation4]  }
 0x15b   :  { %494 = dma.done.wait [#allocation4], 16  }
 0x15c   :  { %495 = vsyncadd [#allocation4], 4294967280 }
 0x15d   :  { %320 = vsyncpa [#allocation4], 1 }

</bundles_post_ra>
